<compile_context>
chip_gen: v7x
topology: tpu7x:2x2x1
jax: 0.10.0
libtpu: 0.0.40
codegen_flags: <defaults>
</compile_context>

<pallas_src>
import jax
import jax.numpy as jnp
from jax.experimental import pallas as pl
from jax.experimental.pallas import tpu as pltpu


# ----------------------------- kernel body ---------------------------------

def _film_kernel(sb_ref, x_ref, o_ref):
    """out = x * scale_plus_one + offset, broadcast along the lane axis.

    sb_ref: (R_TILE, 2) f32 -- column 0 is (scale + 1), column 1 is offset
    x_ref : (R_TILE, S_TILE)
    o_ref : (R_TILE, S_TILE)
    """
    sb = sb_ref[...]
    scale = sb[:, 0:1]
    offset = sb[:, 1:2]
    x = x_ref[...].astype(jnp.float32)
    o_ref[...] = (x * scale + offset).astype(o_ref.dtype)


# --------------------------- tiling heuristics ------------------------------

_MIN_PALLAS_BYTES = 256 * 1024      # below this, let XLA fuse the broadcast
_MIN_PARALLEL_STEPS = 8             # keep enough grid steps for v7x's 2 TCs


def _round_up(x, m):
    return ((x + m - 1) // m) * m


def _round_down(x, m):
    return (x // m) * m


def _block_byte_budget():
    """Per-block byte budget: ~2 MiB on v5e, ~4 MiB elsewhere (v6e/v7x)."""
    try:
        kind = jax.devices()[0].device_kind.lower()
    except Exception:
        kind = ""
    if "v5e" in kind or "v5 lite" in kind or "v5litepod" in kind:
        return 2 * 1024 * 1024
    return 4 * 1024 * 1024


def _choose_tiles(R, S, itemsize, budget):
    """Returns (r_tile, s_tile, full_s).

    Blocks are sized by bytes (<= budget), sublane unit is dtype-aware
    (packed tile height), and full-S contiguous blocks are preferred.
    Non-dividing tiles are fine: the grid uses pl.cdiv and Pallas masks the
    ragged last block, so we never fall back to a full-extent mega-block.
    """
    unit_r = max(8, 32 // max(itemsize, 1))   # 8 f32 / 16 bf16 / 32 int8-fp8
    lane = 128
    r_block_unit = R if R <= unit_r else unit_r   # smallest legal r block

    full_s_rows = budget // max(S * itemsize, 1)
    if full_s_rows >= r_block_unit:
        # Full-S path: each (r_tile, S) block of the flattened (R, S) array is
        # one contiguous HBM region -> single unstrided DMA per block, and the
        # scale/bias tile is fetched exactly once per r block.
        if R <= unit_r:
            return R, S, True
        # Cap r_tile so the grid keeps >= _MIN_PARALLEL_STEPS parallel steps.
        step_cap = max(unit_r, _round_up(pl.cdiv(R, _MIN_PARALLEL_STEPS), unit_r))
        r_tile = max(unit_r, min(_round_down(full_s_rows, unit_r), step_cap))
        return r_tile, S, True

    # S is too large for even a minimal-height full-S block: tile the lane
    # axis too (lane tile a multiple of 128, block bytes <= budget).
    r_tile = r_block_unit
    s_tile = _round_down(budget // max(r_tile * itemsize, 1), lane)
    s_tile = max(lane, s_tile)
    return r_tile, s_tile, False


# ------------------------------- wrapper ------------------------------------

def adaptive_scale(x, emb, weight, bias, *, use_pallas=None, donate_x=False):
    """FiLM conditioning: x * (scale + 1) + bias, channel-wise.

    x: (B, C, H, W), emb: (B, E), weight: (2C, E), bias: (2C,).
    use_pallas: None -> auto (skip Pallas for tiny activations); True/False to force.
    donate_x:   alias x to the output buffer (only if the caller donates x).
    """
    B, C, H, W = x.shape
    _, E = emb.shape
    assert weight.shape == (2 * C, E)
    assert bias.shape == (2 * C,)

    # ---- hoisted conditioning projection (tiny; plain XLA, runs once) ------
    e = emb.astype(jnp.float32)
    e = e * jax.nn.sigmoid(e)                                      # silu
    params = e @ weight.astype(jnp.float32).T + bias.astype(jnp.float32)
    scale_p1 = params[:, :C] + 1.0                                 # fold the +1
    offset = params[:, C:]

    R, S = B * C, H * W
    itemsize = jnp.dtype(x.dtype).itemsize

    if use_pallas is None:
        use_pallas = (R * S * itemsize) >= _MIN_PALLAS_BYTES
    if not use_pallas:
        out = (x.astype(jnp.float32) * scale_p1[:, :, None, None]
               + offset[:, :, None, None])
        return out.astype(x.dtype)

    # ---- lane-dense FiLM kernel ---------------------------------------------
    x_flat = x.reshape(R, S)
    # Pack (scale+1, offset) into one (R, 2) f32 input -> one small DMA/block.
    sb = jnp.concatenate(
        [scale_p1.reshape(R, 1), offset.reshape(R, 1)], axis=1
    ).astype(jnp.float32)

    budget = _block_byte_budget()
    r_tile, s_tile, full_s = _choose_tiles(R, S, itemsize, budget)

    if full_s:
        grid = (pl.cdiv(R, r_tile),)
        sb_spec = pl.BlockSpec((r_tile, 2), lambda r: (r, 0))
        x_spec = pl.BlockSpec((r_tile, S), lambda r: (r, 0))
        o_spec = pl.BlockSpec((r_tile, S), lambda r: (r, 0))
        dims = ("parallel",)
    else:
        grid = (pl.cdiv(R, r_tile), pl.cdiv(S, s_tile))
        sb_spec = pl.BlockSpec((r_tile, 2), lambda r, s: (r, 0))
        x_spec = pl.BlockSpec((r_tile, s_tile), lambda r, s: (r, s))
        o_spec = pl.BlockSpec((r_tile, s_tile), lambda r, s: (r, s))
        dims = ("parallel", "parallel")

    out_flat = pl.pallas_call(
        _film_kernel,
        out_shape=jax.ShapeDtypeStruct((R, S), x.dtype),
        grid_spec=pltpu.PrefetchScalarGridSpec(
            num_scalar_prefetch=0,
            grid=grid,
            in_specs=[sb_spec, x_spec],
            out_specs=o_spec,
        ),
        compiler_params=pltpu.CompilerParams(
            dimension_semantics=dims,
            # Footprint: 2x(x block) + 2x(out block) + 2x(padded sb block)
            # <= ~24 MiB with a 4 MiB budget -> safe on v5e/v6e/v7x.
            vmem_limit_bytes=32 * 1024 * 1024,
        ),
        input_output_aliases=({1: 0} if donate_x else {}),
    )(sb, x_flat)

    return out_flat.reshape(B, C, H, W)


# ------------------------------- reference ----------------------------------

def _reference(x, emb, weight, bias):
    e = emb * jax.nn.sigmoid(emb)
    params = e @ weight.T + bias
    C = x.shape[1]
    scale, b = params[:, :C], params[:, C:]
    return x * (scale[:, :, None, None] + 1.0) + b[:, :, None, None]


if __name__ == "__main__":
    key = jax.random.PRNGKey(0)
    kx, ke, kw, kx2, ke2 = jax.random.split(key, 5)

    # Small shapes consistent with the module: input_dim=2 (NCHW x), emb (B,E).
    B, C, H, W = 2, 4, 16, 16
    E = 32

    x = jax.random.normal(kx, (B, C, H, W), dtype=jnp.float32)
    emb = jax.random.normal(ke, (B, E), dtype=jnp.float32)

    # default_init(1.0) ~ variance_scaling(1.0, fan_avg, uniform); bias = 0.
    weight = jax.nn.initializers.variance_scaling(
        1.0, "fan_avg", "uniform"
    )(kw, (2 * C, E), jnp.float32)
    bias = jnp.zeros((2 * C,), dtype=jnp.float32)

    # Force the Pallas path even at this tiny test size so the kernel is
    # actually compiled and executed on TPU.
    out = adaptive_scale(x, emb, weight, bias, use_pallas=True)
    out = jax.block_until_ready(out)
    ref = _reference(x, emb, weight, bias)
    assert out.shape == (B, C, H, W)
    assert jnp.allclose(out, ref, atol=1e-5, rtol=1e-5)

    # Second check: R (=B*C) not a multiple of the 8-row tile and S (=H*W) not
    # a multiple of 128 -> exercises the ragged (masked) last block instead of
    # the old full-extent fallback.
    B2, C2, H2, W2 = 2, 6, 24, 40   # R = 12, S = 960
    x2 = jax.random.normal(kx2, (B2, C2, H2, W2), dtype=jnp.float32)
    emb2 = jax.random.normal(ke2, (B2, E), dtype=jnp.float32)
    weight2 = jax.nn.initializers.variance_scaling(
        1.0, "fan_avg", "uniform"
    )(jax.random.fold_in(kw, 1), (2 * C2, E), jnp.float32)
    bias2 = jnp.zeros((2 * C2,), dtype=jnp.float32)

    out2 = jax.block_until_ready(
        adaptive_scale(x2, emb2, weight2, bias2, use_pallas=True))
    ref2 = _reference(x2, emb2, weight2, bias2)
    assert out2.shape == (B2, C2, H2, W2)
    assert jnp.allclose(out2, ref2, atol=1e-5, rtol=1e-5)

    print("KERNEL_OK")
</pallas_src>

<mosaic_0001>
module attributes {stable_mosaic.version = 11 : i64} {
  func.func @_film_kernel(%arg0: i32, %arg1: memref<8x2xf32, #tpu.memory_space<vmem>>, %arg2: memref<8x256xf32, #tpu.memory_space<vmem>>, %arg3: memref<8x256xf32, #tpu.memory_space<vmem>>) attributes {dimension_semantics = [#tpu.dimension_semantics<parallel>], iteration_bounds = array<i64: 1>, scalar_prefetch = 0 : i64, scratch_operands = 0 : i64, tpu.core_type = #tpu.core_type<tc>, window_params = [{transform_indices = @transform_0, window_bounds = array<i64: 8, 2>}, {transform_indices = @transform_1, window_bounds = array<i64: 8, 256>}, {transform_indices = @transform_2, window_bounds = array<i64: 8, 256>}]} {
    %c0 = arith.constant 0 : index
    %c0_0 = arith.constant 0 : index
    %0 = vector.load %arg1[%c0, %c0_0] : memref<8x2xf32, #tpu.memory_space<vmem>>, vector<8x2xf32>
    %1 = vector.extract_strided_slice %0 {offsets = [0, 0], sizes = [8, 1], strides = [1, 1]} : vector<8x2xf32> to vector<8x1xf32>
    %2 = vector.extract_strided_slice %0 {offsets = [0, 1], sizes = [8, 1], strides = [1, 1]} : vector<8x2xf32> to vector<8x1xf32>
    %c0_1 = arith.constant 0 : index
    %c0_2 = arith.constant 0 : index
    %3 = vector.load %arg2[%c0_1, %c0_2] : memref<8x256xf32, #tpu.memory_space<vmem>>, vector<8x256xf32>
    %4 = vector.broadcast %1 : vector<8x1xf32> to vector<8x256xf32>
    %5 = arith.mulf %3, %4 : vector<8x256xf32>
    %6 = vector.broadcast %2 : vector<8x1xf32> to vector<8x256xf32>
    %7 = arith.addf %5, %6 : vector<8x256xf32>
    %c0_3 = arith.constant 0 : index
    %c0_4 = arith.constant 0 : index
    %8 = vector.load %arg3[%c0_3, %c0_4] : memref<8x256xf32, #tpu.memory_space<vmem>>, vector<8x256xf32>
    tpu.vector_store %arg3[%c0_3, %c0_4], %7 {strides = array<i32>} : memref<8x256xf32, #tpu.memory_space<vmem>>, vector<8x256xf32>,
    return
  }
  func.func @transform_0(%arg0: i32) -> (i32, i32) {
    %c0_i32 = arith.constant 0 : i32
    %c0_i32_0 = arith.constant 0 : i32
    return %arg0, %c0_i32 : i32, i32
  }
  func.func @transform_1(%arg0: i32) -> (i32, i32) {
    %c0_i32 = arith.constant 0 : i32
    %c0_i32_0 = arith.constant 0 : i32
    return %arg0, %c0_i32 : i32, i32
  }
  func.func @transform_2(%arg0: i32) -> (i32, i32) {
    %c0_i32 = arith.constant 0 : i32
    %c0_i32_0 = arith.constant 0 : i32
    return %arg0, %c0_i32 : i32, i32
  }
}

</mosaic_0001>

<bundles_post_ra>
// kernel: tpu_custom_call.1
= control target key start
LH: loop header
LB: loop body
LE: loop exit
PB: predicated region body
PF: predicated region fallthrough
CT: control target
= control target key end

     0   :  { %7 = vsyncpa [#allocation3], 0  ;;  %s157_s0 = inlined_call_operand.vmem [shape: f32[8,2], index: 0, kind: input, shape index: {}]   ;;  %s158_s1 = inlined_call_operand.hbm [shape: f32[8,256], index: 1, kind: input, shape index: {}]   ;;  %s159_s2 = inlined_call_operand.hbm [shape: f32[8,256], index: 2, kind: output, shape index: {}]  }
   0x1   :  { %8 = vsyncpa [#allocation4], 0  ;;  %s111_s9 = smov [#allocation2]   ;;  %s63_s13 = scalar_lea.hbm %s158_s1, 256 }
   0x2   :  { %s17_s10 = sshll.u32 %s111_s9, 4  ;;  %p64_p0 = scmp.ne.s32.totalorder %s158_s1, %s63_s13  ;;  %s18_s10 = int_to_ptr.vmem [resolvable:$true] %s17_s10 }
   0x3   :  { %p67_p1 = scmp.lt.u32.totalorder %s63_s13, %s158_s1 }
   0x5   :  { %p69_p2 = pnand %p67_p1, %p64_p0 }
   0x7   :  { %72 = shalt.err (!%p69_p2)
}
   0x8   :  { %s73_s18 = scalar_lea.vmem %s18_s10, 256  ;;  %p78_p4 = scmp.lt.s32.totalorder %s18_s10, %s18_s10 }
   0x9   :  { %p74_p3 = scmp.ne.s32.totalorder %s18_s10, %s73_s18  ;;  %p79_p5 = scmp.lt.s32.totalorder %s73_s18, %s73_s18 }
   0xb   :  { %p80_p6 = por %p79_p5, %p78_p4 }
   0xd   :  { %p81_p7 = pnand %p80_p6, %p74_p3 }
   0xf   :  { %84 = shalt.err (!%p81_p7)
}
  0x10   :  { %20 = dma.hbm_to_vmem [thread:$0]  %s158_s1, 256, %s18_s10, [#allocation3]  }
  0x11   :  { %107 = dma.done.wait [#allocation3], 256  }
  0x12   :  { %108 = vsyncadd [#allocation3], 4294967040  ;;  %v112_v0 = vmov 0   ;;  %v24_v1 = vld [vmem:[%s157_s0] sm:$0xff]  ;;  %v113_v2 = vmov 1   ;;  %v26_v5 = vld [vmem:[#allocation2 + $0x8] sm:$0xff] }
  0x13   :  { %61 = vset.pattern.permute.xlu0 %v112_v0  ;;  %v25_v4 = vld [vmem:[#allocation2] sm:$0xff]  ;;  %s114_s23 = smov [#allocation5]  }
  0x14   :  { %29 = vperm.xlu0 %61, %v24_v1   ;;  %s48_s24 = sshll.u32 %s114_s23, 4  ;;  %s49_s24 = int_to_ptr.vmem [resolvable:$true] %s48_s24 }
  0x15   :  { %s85_s1 = scalar_lea.vmem %s49_s24, 256  ;;  %p90_p9 = scmp.lt.s32.totalorder %s49_s24, %s49_s24 }
  0x16   :  { %p86_p8 = scmp.ne.s32.totalorder %s49_s24, %s85_s1  ;;  %p91_p10 = scmp.lt.s32.totalorder %s85_s1, %s85_s1 }
  0x18   :  { %62 = vset.pattern.permute.xlu0 %v113_v2  ;;  %p92_p11 = por %p91_p10, %p90_p9 }
  0x19   :  { %35 = vperm.xlu0 %62, %v24_v1  }
  0x1a   :  { %p93_p12 = pnand %p92_p11, %p86_p8 }
  0x93   :  { %v30_v3 = vpop.permute.xlu0 %29 }
  0x94   :  { %v32_v6 = vmul.f32 %v30_v3, %v25_v4  ;;  %v33_v7 = vmul.f32 %v30_v3, %v26_v5 }
  0x98   :  { %v36_v8 = vpop.permute.xlu0 %35 }
  0x99   :  { %v38_v9 = vadd.f32 %v36_v8, %v32_v6  ;;  %v39_v10 = vadd.f32 %v36_v8, %v33_v7 }
  0x9b   :  { %40 = vst [vmem:[#allocation5] sm:$0xff] %v38_v9  ;;  %41 = vst [vmem:[#allocation5 + $0x8] sm:$0xff] %v39_v10 }
  0x9c   :  { %96 = shalt.err (!%p93_p12)
}
  0x9d   :  { %s97_s26 = scalar_lea.hbm %s159_s2, 256 }
  0x9e   :  { %p98_p13 = scmp.ne.s32.totalorder %s159_s2, %s97_s26  ;;  %p101_p0 = scmp.lt.u32.totalorder %s97_s26, %s159_s2 }
  0xa0   :  { %p103_p1 = pnand %p101_p0, %p98_p13 }
  0xa2   :  { %106 = shalt.err (!%p103_p1)
}
  0xa3   :  { %51 = dma.vmem_to_hbm [thread:$0]  %s49_s24, 256, %s159_s2, [#allocation4]  }
  0xa4   :  { %109 = dma.done.wait [#allocation4], 256  }
  0xa5   :  { %110 = vsyncadd [#allocation4], 4294967040 }
  0xa6   :  { %55 = vsyncpa [#allocation3], 1 }
  0xa7   :  { %56 = vsyncpa [#allocation4], 1 }

</bundles_post_ra>
